<compile_context>
chip_gen: v6e
topology: v6e:2x2x1
jax: 0.10.0
libtpu: 0.0.40
codegen_flags: <defaults>
</compile_context>

<pallas_src>
import functools

import jax
import jax.numpy as jnp
from jax.experimental import pallas as pl
from jax.experimental.pallas import tpu as pltpu


def _round_up(v, m):
    return -(-v // m) * m


def _linear_kernel(x_ref, wt_ref, b_ref, o_ref, acc_ref):
    # x_ref:  (tm, tk)  activation tile
    # wt_ref: (tk, tn)  weight tile, already stored as (din, dout)
    # b_ref:  (1, tn)   bias tile
    # o_ref:  (tm, tn)  output tile (written on the last k step)
    # acc_ref:(tm, tn)  float32 accumulator scratch, persists across k
    k = pl.program_id(2)

    @pl.when(k == 0)
    def _init():
        # Fold the bias into the accumulator init (no extra epilogue pass).
        acc_ref[...] = jnp.broadcast_to(
            b_ref[...].astype(jnp.float32), acc_ref.shape)

    # Plain (M,K)x(K,N) contraction on the MXU -- no per-tile RHS transpose.
    acc_ref[...] += jnp.dot(x_ref[...], wt_ref[...],
                            preferred_element_type=jnp.float32)

    @pl.when(k == pl.num_programs(2) - 1)
    def _writeback():
        o_ref[...] = acc_ref[...].astype(o_ref.dtype)


@functools.partial(
    jax.jit,
    static_argnames=("tm", "tn", "tk", "compute_dtype", "allow_fallback"))
def linear_regressor(x, weight, bias, *, tm=512, tn=512, tk=1024,
                     compute_dtype=None, allow_fallback=True):
    """Forward of nn.Linear(input_dim, output_dim): y = x @ weight.T + bias.

    Args:
      x:      (B, input_dim) float32
      weight: (output_dim, input_dim) float32 (PyTorch layout)
      bias:   (output_dim,) float32
      compute_dtype: optional MXU operand dtype (e.g. jnp.bfloat16); the
        accumulator, bias and output stay float32.
    Returns:
      (B, output_dim) in x.dtype
    """
    B, din = x.shape
    dout = weight.shape[0]
    out_dtype = x.dtype

    kp0 = _round_up(din, 128)   # padded contracted dim (lane aligned)
    np0 = _round_up(dout, 128)  # padded output-feature dim (lane aligned)

    # Small-shape fallback: padding + pallas_call overhead would dominate.
    if allow_fallback and _round_up(B, 8) * kp0 * np0 <= (1 << 21):
        return (x @ weight.T + bias).astype(out_dtype)

    # ---- Tile selection: clamp to the (padded) problem, keep alignment. ----
    tm = _round_up(min(tm, _round_up(B, 8)), 8)
    tn = _round_up(min(tn, np0), 128)
    tk = _round_up(min(tk, kp0), 128)

    kp = _round_up(kp0, tk)    # K must be an exact tile multiple (zero pad)
    np_ = _round_up(np0, tn)   # N padded -> full, unmasked lane-dense stores

    grid_m = pl.cdiv(B, tm)    # ragged batch edge handled by the grid, not by
                               # padding x (OOB rows never reach the output)
    grid = (grid_m, np_ // tn, kp // tk)

    # ---- One-time parameter prep (in a real model: done at init time). ----
    # Pre-transpose the weight to (din, dout) so the kernel needs no re-layout.
    w_t = weight.T
    if kp != din or np_ != dout:
        w_t = jnp.pad(w_t, ((0, kp - din), (0, np_ - dout)))
    b_p = (bias if np_ == dout else jnp.pad(bias, (0, np_ - dout))
           ).reshape(1, np_)

    # Only the contracted dim of x needs zero padding (correctness).
    x_p = x if kp == din else jnp.pad(x, ((0, 0), (0, kp - din)))

    if compute_dtype is not None:
        x_p = x_p.astype(compute_dtype)
        w_t = w_t.astype(compute_dtype)

    in_itemsize = jnp.dtype(x_p.dtype).itemsize
    out_itemsize = jnp.dtype(out_dtype).itemsize

    # Double-buffered working set; derive the scoped-VMEM limit from it so
    # the default tiles (~11 MiB f32) fit every generation incl. v7x (64 MiB
    # physical). Larger tiles on v5e/v6e can push this up to the 96 MiB cap.
    working_set = (2 * (tm * tk + tk * tn) * in_itemsize   # x / W buffers
                   + 2 * tm * tn * out_itemsize            # output buffers
                   + tm * tn * 4                            # f32 accumulator
                   + 2 * tn * 4)                            # bias
    vmem_limit = min(max(32 * 1024 * 1024, (working_set * 3) // 2),
                     96 * 1024 * 1024)

    # Real HBM traffic includes the x / W re-streaming factors.
    cost = pl.CostEstimate(
        flops=2 * B * kp * np_,
        transcendentals=0,
        bytes_accessed=int(in_itemsize * (B * kp * grid[1] + kp * np_ * grid_m)
                           + out_itemsize * B * np_ + 4 * np_))

    out_p = pl.pallas_call(
        _linear_kernel,
        out_shape=jax.ShapeDtypeStruct((B, np_), out_dtype),
        grid_spec=pltpu.PrefetchScalarGridSpec(
            num_scalar_prefetch=0,
            grid=grid,
            in_specs=[
                pl.BlockSpec((tm, tk), lambda i, j, k: (i, k)),   # x tile
                pl.BlockSpec((tk, tn), lambda i, j, k: (k, j)),   # W^T tile
                pl.BlockSpec((1, tn), lambda i, j, k: (0, j)),    # bias tile
            ],
            out_specs=pl.BlockSpec((tm, tn), lambda i, j, k: (i, j)),
            scratch_shapes=[pltpu.VMEM((tm, tn), jnp.float32)],
        ),
        compiler_params=pltpu.CompilerParams(
            dimension_semantics=("parallel", "parallel", "arbitrary"),
            vmem_limit_bytes=int(vmem_limit)),
        cost_estimate=cost,
    )(x_p, w_t, b_p)

    # TODO(synk): the feature-dim slice is an extra HBM pass; a real model
    # would keep dout padded end-to-end and never slice.
    return out_p if np_ == dout else out_p[:, :dout]


if __name__ == "__main__":
    key = jax.random.PRNGKey(0)
    kx, kw, kb, kx2, kw2, kb2 = jax.random.split(key, 6)

    # ---- Test 1: module-spec shapes (small regressor head). Force the
    # Pallas path (the auto-dispatcher would use the XLA fallback here).
    B, IN_DIM, OUT_DIM = 8, 32, 16
    bound = 1.0 / (IN_DIM ** 0.5)
    x = jax.random.normal(kx, (B, IN_DIM), dtype=jnp.float32)
    weight = jax.random.uniform(kw, (OUT_DIM, IN_DIM),
                                minval=-bound, maxval=bound, dtype=jnp.float32)
    bias = jax.random.uniform(kb, (OUT_DIM,),
                              minval=-bound, maxval=bound, dtype=jnp.float32)

    out = linear_regressor(x, weight, bias, allow_fallback=False)
    jax.block_until_ready(out)
    ref = x @ weight.T + bias
    assert out.shape == (B, OUT_DIM)
    assert jnp.allclose(out, ref, atol=1e-5, rtol=1e-5)

    # ---- Test 2: multi-step (i, j, k) grid with ragged batch rows and
    # padded K/N dims; small explicit tiles exercise the k-reduction pipeline.
    B2, IN2, OUT2 = 203, 384, 200
    bound2 = 1.0 / (IN2 ** 0.5)
    x2 = jax.random.normal(kx2, (B2, IN2), dtype=jnp.float32)
    w2 = jax.random.uniform(kw2, (OUT2, IN2),
                            minval=-bound2, maxval=bound2, dtype=jnp.float32)
    b2 = jax.random.uniform(kb2, (OUT2,),
                            minval=-bound2, maxval=bound2, dtype=jnp.float32)

    out2 = linear_regressor(x2, w2, b2, tm=128, tn=128, tk=128,
                            allow_fallback=False)
    jax.block_until_ready(out2)
    ref2 = x2 @ w2.T + b2
    assert out2.shape == (B2, OUT2)
    assert jnp.allclose(out2, ref2, atol=1e-4, rtol=1e-4)

    # ---- Test 3: bf16 MXU operands, f32 accumulation (looser tolerance).
    out3 = linear_regressor(x2, w2, b2, compute_dtype=jnp.bfloat16,
                            allow_fallback=False)
    jax.block_until_ready(out3)
    assert jnp.allclose(out3, ref2, atol=5e-2, rtol=5e-2)

    print("KERNEL_OK")
</pallas_src>

<mosaic_0001>
module attributes {stable_mosaic.version = 11 : i64} {
  func.func @_linear_kernel(%arg0: i32, %arg1: i32, %arg2: i32, %arg3: memref<8x128xf32, #tpu.memory_space<vmem>>, %arg4: memref<128x128xf32, #tpu.memory_space<vmem>>, %arg5: memref<1x128xf32, #tpu.memory_space<vmem>>, %arg6: memref<8x128xf32, #tpu.memory_space<vmem>>, %arg7: memref<8x128xf32, #tpu.memory_space<vmem>>) attributes {dimension_semantics = [#tpu.dimension_semantics<parallel>, #tpu.dimension_semantics<parallel>, #tpu.dimension_semantics<arbitrary>], iteration_bounds = array<i64: 1, 1, 1>, scalar_prefetch = 0 : i64, scratch_operands = 1 : i64, tpu.core_type = #tpu.core_type<tc>, window_params = [{transform_indices = @transform_0, window_bounds = array<i64: 8, 128>}, {transform_indices = @transform_1, window_bounds = array<i64: 128, 128>}, {transform_indices = @transform_2, window_bounds = array<i64: 1, 128>}, {transform_indices = @transform_3, window_bounds = array<i64: 8, 128>}]} {
    %c0_i32 = arith.constant 0 : i32
    %0 = arith.cmpi eq, %arg2, %c0_i32 : i32
    %1 = arith.extui %0 : i1 to i32
    %c0_i32_0 = arith.constant 0 : i32
    %2 = arith.cmpi ne, %1, %c0_i32_0 : i32
    scf.if %2 {
      %c0_10 = arith.constant 0 : index
      %c0_11 = arith.constant 0 : index
      %12 = vector.load %arg5[%c0_10, %c0_11] : memref<1x128xf32, #tpu.memory_space<vmem>>, vector<1x128xf32>
      %13 = vector.shape_cast %12 : vector<1x128xf32> to vector<1x128xf32>
      %14 = vector.broadcast %13 : vector<1x128xf32> to vector<8x128xf32>
      %c0_12 = arith.constant 0 : index
      %c0_13 = arith.constant 0 : index
      %15 = vector.load %arg7[%c0_12, %c0_13] : memref<8x128xf32, #tpu.memory_space<vmem>>, vector<8x128xf32>
      tpu.vector_store %arg7[%c0_12, %c0_13], %14 {strides = array<i32>} : memref<8x128xf32, #tpu.memory_space<vmem>>, vector<8x128xf32>,
    } else {
    }
    %c0 = arith.constant 0 : index
    %c0_1 = arith.constant 0 : index
    %3 = vector.load %arg7[%c0, %c0_1] : memref<8x128xf32, #tpu.memory_space<vmem>>, vector<8x128xf32>
    %c0_2 = arith.constant 0 : index
    %c0_3 = arith.constant 0 : index
    %4 = vector.load %arg3[%c0_2, %c0_3] : memref<8x128xf32, #tpu.memory_space<vmem>>, vector<8x128xf32>
    %c0_4 = arith.constant 0 : index
    %c0_5 = arith.constant 0 : index
    %5 = vector.load %arg4[%c0_4, %c0_5] : memref<128x128xf32, #tpu.memory_space<vmem>>, vector<128x128xf32>
    %cst = arith.constant dense<0.000000e+00> : vector<8x128xf32>
    %6 = tpu.matmul %4, %5, %cst {dimension_numbers = #tpu.dot_dimension_numbers<[1], [0], [0], [1], [0, 0, 1, 1], [], []>} : vector<8x128xf32>, vector<128x128xf32>, vector<8x128xf32> -> vector<8x128xf32>
    %7 = arith.addf %3, %6 : vector<8x128xf32>
    %c0_6 = arith.constant 0 : index
    %c0_7 = arith.constant 0 : index
    %8 = vector.load %arg7[%c0_6, %c0_7] : memref<8x128xf32, #tpu.memory_space<vmem>>, vector<8x128xf32>
    tpu.vector_store %arg7[%c0_6, %c0_7], %7 {strides = array<i32>} : memref<8x128xf32, #tpu.memory_space<vmem>>, vector<8x128xf32>,
    %c0_i32_8 = arith.constant 0 : i32
    %9 = arith.cmpi eq, %arg2, %c0_i32_8 : i32
    %10 = arith.extui %9 : i1 to i32
    %c0_i32_9 = arith.constant 0 : i32
    %11 = arith.cmpi ne, %10, %c0_i32_9 : i32
    scf.if %11 {
      %c0_10 = arith.constant 0 : index
      %c0_11 = arith.constant 0 : index
      %12 = vector.load %arg7[%c0_10, %c0_11] : memref<8x128xf32, #tpu.memory_space<vmem>>, vector<8x128xf32>
      %c0_12 = arith.constant 0 : index
      %c0_13 = arith.constant 0 : index
      %13 = vector.load %arg6[%c0_12, %c0_13] : memref<8x128xf32, #tpu.memory_space<vmem>>, vector<8x128xf32>
      tpu.vector_store %arg6[%c0_12, %c0_13], %12 {strides = array<i32>} : memref<8x128xf32, #tpu.memory_space<vmem>>, vector<8x128xf32>,
    } else {
    }
    return
  }
  func.func @transform_0(%arg0: i32, %arg1: i32, %arg2: i32) -> (i32, i32) {
    %c0_i32 = arith.constant 0 : i32
    return %arg0, %arg2 : i32, i32
  }
  func.func @transform_1(%arg0: i32, %arg1: i32, %arg2: i32) -> (i32, i32) {
    %c0_i32 = arith.constant 0 : i32
    return %arg2, %arg1 : i32, i32
  }
  func.func @transform_2(%arg0: i32, %arg1: i32, %arg2: i32) -> (i32, i32) {
    %c0_i32 = arith.constant 0 : i32
    %c0_i32_0 = arith.constant 0 : i32
    return %c0_i32, %arg1 : i32, i32
  }
  func.func @transform_3(%arg0: i32, %arg1: i32, %arg2: i32) -> (i32, i32) {
    %c0_i32 = arith.constant 0 : i32
    return %arg0, %arg1 : i32, i32
  }
}

</mosaic_0001>

<bundles_post_ra>
// kernel: linear_regressor.1
= control target key start
LH: loop header
LB: loop body
LE: loop exit
PB: predicated region body
PF: predicated region fallthrough
CT: control target
= control target key end

     0   :  { %v214_v1 = vmov 0.0   ;;  %vm215_vm0 = vmmov 0   ;;  %s294_s0 = inlined_call_operand.vmem [shape: f32[8,128], index: 0, kind: input, shape index: {}]   ;;  %s295_s1 = inlined_call_operand.vmem [shape: f32[128,128], index: 1, kind: input, shape index: {}]   ;;  %s296_s2 = inlined_call_operand.vmem [shape: f32[1,128], index: 2, kind: input, shape index: {}]   ;;  %s297_s3 = inlined_call_operand.hbm [shape: f32[8,128], index: 3, kind: output, shape index: {}]  }
   0x1   :  { %v44_v0 = vld [vmem:[%s295_s1 + $0x78] sm:$0xff]  ;;  %154 = vmatprep.subr.mxu0 %v214_v1  ;;  %v43_v2 = vld [vmem:[%s295_s1 + $0x70] sm:$0xff]  ;;  %186 = vmatprep.mubr.msk.f32.mxu0 %vm215_vm0, %v214_v1  ;;  %v42_v3 = vld [vmem:[%s295_s1 + $0x68] sm:$0xff] }
   0x2   :  { %155 = vmatpush3.msra.mxu0 %v44_v0  ;;  %v41_v4 = vld [vmem:[%s295_s1 + $0x60] sm:$0xff] }
   0x3   :  { %156 = vmatprep.subr.mxu0 %v214_v1 }
   0x4   :  { %157 = vmatpush3.msra.mxu0 %v43_v2 }
   0x5   :  { %158 = vmatprep.subr.mxu0 %v214_v1 }
   0x6   :  { %159 = vmatpush3.msra.mxu0 %v42_v3 }
   0x7   :  { %8 = vsyncpa [#allocation4], 0  ;;  %160 = vmatprep.subr.mxu0 %v214_v1  ;;  %v40_v5 = vld [vmem:[%s295_s1 + $0x58] sm:$0xff]  ;;  %v39_v6 = vld [vmem:[%s295_s1 + $0x50] sm:$0xff]  ;;  %s216_s21 = smov [#allocation3]  }
   0x8   :  { %161 = vmatpush3.msra.mxu0 %v41_v4  ;;  %v38_v7 = vld [vmem:[%s295_s1 + $0x48] sm:$0xff]  ;;  %v37_v8 = vld [vmem:[%s295_s1 + $0x40] sm:$0xff]  ;;  %v36_v9 = vld [vmem:[%s295_s1 + $0x38] sm:$0xff]  ;;  %s128_s22 = sshll.u32 %s216_s21, 4  ;;  %s129_s22 = int_to_ptr.vmem [resolvable:$true] %s128_s22 }
   0x9   :  { %162 = vmatprep.subr.mxu0 %v214_v1  ;;  %v35_v10 = vld [vmem:[%s295_s1 + $0x30] sm:$0xff]  ;;  %v34_v11 = vld [vmem:[%s295_s1 + $0x28] sm:$0xff]  ;;  %v33_v12 = vld [vmem:[%s295_s1 + $0x20] sm:$0xff]  ;;  %p197_p1 = scmp.lt.s32.totalorder %s129_s22, %s129_s22 }
   0xa   :  { %163 = vmatpush3.msra.mxu0 %v40_v5  ;;  %v32_v13 = vld [vmem:[%s295_s1 + $0x18] sm:$0xff]  ;;  %v31_v14 = vld [vmem:[%s295_s1 + $0x10] sm:$0xff]  ;;  %v30_v15 = vld [vmem:[%s295_s1 + $0x8] sm:$0xff] }
   0xb   :  { %164 = vmatprep.subr.mxu0 %v214_v1  ;;  %v29_v16 = vld [vmem:[%s295_s1] sm:$0xff]  ;;  %s192_s1 = scalar_lea.vmem %s129_s22, 128 }
   0xc   :  { %165 = vmatpush3.msra.mxu0 %v39_v6  ;;  %v28_v17 = vld [vmem:[%s294_s0] sm:$0xff]  ;;  %p193_p0 = scmp.ne.s32.totalorder %s129_s22, %s192_s1  ;;  %p198_p2 = scmp.lt.s32.totalorder %s192_s1, %s192_s1 }
   0xd   :  { %166 = vmatprep.subr.mxu0 %v214_v1  ;;  %v136_v18 = vld [vmem:[%s296_s2] ss:$0 sm:$0xff] }
   0xe   :  { %167 = vmatpush3.msra.mxu0 %v38_v7  ;;  %p199_p3 = por %p198_p2, %p197_p1 }
   0xf   :  { %168 = vmatprep.subr.mxu0 %v214_v1 }
  0x10   :  { %169 = vmatpush3.msra.mxu0 %v37_v8  ;;  %p200_p4 = pnand %p199_p3, %p193_p0 }
  0x11   :  { %170 = vmatprep.subr.mxu0 %v214_v1 }
  0x12   :  { %171 = vmatpush3.msra.mxu0 %v36_v9 }
  0x13   :  { %172 = vmatprep.subr.mxu0 %v214_v1 }
  0x14   :  { %173 = vmatpush3.msra.mxu0 %v35_v10 }
  0x15   :  { %174 = vmatprep.subr.mxu0 %v214_v1 }
  0x16   :  { %175 = vmatpush3.msra.mxu0 %v34_v11 }
  0x17   :  { %176 = vmatprep.subr.mxu0 %v214_v1 }
  0x18   :  { %177 = vmatpush3.msra.mxu0 %v33_v12 }
  0x19   :  { %178 = vmatprep.subr.mxu0 %v214_v1 }
  0x1a   :  { %179 = vmatpush3.msra.mxu0 %v32_v13 }
  0x1b   :  { %180 = vmatprep.subr.mxu0 %v214_v1 }
  0x1c   :  { %181 = vmatpush3.msra.mxu0 %v31_v14 }
  0x1d   :  { %182 = vmatprep.subr.mxu0 %v214_v1 }
  0x1e   :  { %183 = vmatpush3.msra.mxu0 %v30_v15 }
  0x1f   :  { %184 = vmatprep.subr.mxu0 %v214_v1 }
  0x20   :  { %185 = vmatpush3.msra.mxu0 %v29_v16 }
  0x21   :  { %187 = vmatmul.mubr.f32.vlgmr.msra.gmra.mxu0 %v28_v17 }
  0xe1   :  { %v111_v19 = vpop.f32.mrf.mxu0 }
  0xe2   :  { %v115_v20 = vadd.f32 %v136_v18, %v111_v19 }
  0xe3   :  { %v188_v21 = vpop.f32.mrf.mxu0 }
  0xe4   :  { %121 = vst [vmem:[#allocation3] sm:$0xff] %v115_v20 }
  0xe5   :  { %203 = shalt.err (!%p200_p4)
}
  0xe6   :  { %131 = dma.vmem_to_hbm [thread:$0]  %s129_s22, 128, %s297_s3, [#allocation4]  }
  0xe7   :  { %212 = dma.done.wait [#allocation4], 128  }
  0xe8   :  { %213 = vsyncadd [#allocation4], 4294967168 }
  0xe9   :  { %135 = vsyncpa [#allocation4], 1 }

</bundles_post_ra>
